<compile_context>
chip_gen: v7x
topology: tpu7x:2x2x1
jax: 0.10.0
libtpu: 0.0.40
codegen_flags: <defaults>
</compile_context>

<pallas_src>
import jax
import jax.numpy as jnp
from jax.experimental import pallas as pl
from jax.experimental.pallas import tpu as pltpu


def _outconv_kernel_vpu(w_ref, b_ref, x_ref, o_ref):
    """Tiny-channel path: weights/bias are SMEM scalars, contraction on the VPU.

    w_ref: SMEM (Cout, Cin)   b_ref: SMEM (Cout,)
    x_ref: VMEM (Cin, THW)    o_ref: VMEM (Cout, THW)
    """
    cout, cin = w_ref.shape
    x = x_ref[...].astype(jnp.float32)                      # (Cin, THW)
    for oc in range(cout):                                  # small static unroll
        acc = jnp.zeros((1, x.shape[-1]), jnp.float32)
        for ic in range(cin):
            acc = acc + w_ref[oc, ic] * x[ic:ic + 1, :]     # scalar * vector FMA
        o_ref[oc:oc + 1, :] = (acc + b_ref[oc]).astype(o_ref.dtype)


def _outconv_kernel_mxu(w_ref, b_ref, x_ref, o_ref):
    """General path: (Cout, Cin) @ (Cin, THW) on the MXU, f32 accumulation.

    w_ref: VMEM (Cout, Cin)   b_ref: VMEM (Cout, 1)
    x_ref: VMEM (Cin, THW)    o_ref: VMEM (Cout, THW)
    """
    acc = jnp.dot(w_ref[...], x_ref[...], preferred_element_type=jnp.float32)
    o_ref[...] = (acc + b_ref[...]).astype(o_ref.dtype)


def outconv_pallas(x_nchw, weight, bias, *,
                   max_tile_hw=2048,
                   vmem_tile_budget=16 * 1024 * 1024):
    """1x1 conv. x_nchw: (N, Cin, H, W); weight: (Cout, Cin, 1, 1); bias: (Cout,)."""
    N, Cin, H, W = x_nchw.shape
    Cout = weight.shape[0]
    HW = H * W

    # Free reshapes only — no transposes, no padding copies.
    x3 = x_nchw.reshape(N, Cin, HW)
    w_mat = weight.reshape(Cout, Cin)

    # --- Spatial tile selection ---------------------------------------------
    itemsize = x_nchw.dtype.itemsize
    # Double-buffered x/out tiles must fit well under the 32 MiB scoped VMEM
    # default (v7x physical VMEM is only 64 MiB); weights/bias are negligible.
    t_cap = vmem_tile_budget // max(1, 2 * (Cin + Cout) * itemsize)
    t_cap = max(128, min(int(t_cap), max_tile_hw))
    if HW <= t_cap:
        t_hw = HW                              # full spatial extent in one tile
    else:
        t_hw = (t_cap // 128) * 128            # lane-aligned tile
    # Keep >= 2 total grid steps so both TensorCores on v7x get work.
    if N * pl.cdiv(HW, t_hw) < 2 and HW >= 256 and HW % 256 == 0:
        t_hw = HW // 2

    grid = (N, pl.cdiv(HW, t_hw))

    flops = 2 * N * HW * Cin * Cout
    bytes_accessed = (x3.size * x3.dtype.itemsize
                      + N * Cout * HW * x3.dtype.itemsize
                      + w_mat.size * w_mat.dtype.itemsize
                      + bias.size * bias.dtype.itemsize)
    cost = pl.CostEstimate(flops=flops, transcendentals=0,
                           bytes_accessed=bytes_accessed)

    # Block specs: batch dim squeezed, spatial tile on lanes (lane-dense output).
    x_spec = pl.BlockSpec((None, Cin, t_hw), lambda n, j: (n, 0, j))
    o_spec = pl.BlockSpec((None, Cout, t_hw), lambda n, j: (n, 0, j))

    use_vpu = (Cin <= 8) and (Cout <= 8)
    if use_vpu:
        kernel = _outconv_kernel_vpu
        w_arg, b_arg = w_mat, bias
        w_spec = pl.BlockSpec(memory_space=pltpu.MemorySpace.SMEM)
        b_spec = pl.BlockSpec(memory_space=pltpu.MemorySpace.SMEM)
    else:
        kernel = _outconv_kernel_mxu
        w_arg, b_arg = w_mat, bias.reshape(Cout, 1)
        w_spec = pl.BlockSpec((Cout, Cin), lambda n, j: (0, 0))   # resident
        b_spec = pl.BlockSpec((Cout, 1), lambda n, j: (0, 0))     # resident

    out3 = pl.pallas_call(
        kernel,
        out_shape=jax.ShapeDtypeStruct((N, Cout, HW), x_nchw.dtype),
        grid=grid,
        in_specs=[w_spec, b_spec, x_spec],
        out_specs=o_spec,
        compiler_params=pltpu.CompilerParams(
            dimension_semantics=("parallel", "parallel")),
        cost_estimate=cost,
    )(w_arg, b_arg, x3)

    return out3.reshape(N, Cout, H, W)


def outconv_reference(x_nchw, weight, bias):
    """Pure-JAX reference for a 1x1 Conv2d (NCHW)."""
    w_mat = weight.reshape(weight.shape[0], weight.shape[1])  # (Cout, Cin)
    y = jnp.einsum("nchw,oc->nohw", x_nchw, w_mat)
    return y + bias[None, :, None, None]


if __name__ == "__main__":
    key = jax.random.PRNGKey(0)

    # --- Case 1: tiny channels (VPU path), matches the module's typical use ---
    in_channels, out_channels = 4, 3
    N, H, W = 2, 16, 16
    kx, kw, kb, key = *jax.random.split(key, 3), jax.random.split(key, 4)[3]

    x = jax.random.normal(kx, (N, in_channels, H, W), dtype=jnp.float32)
    bound = 1.0 / (in_channels ** 0.5)
    weight = jax.random.uniform(
        kw, (out_channels, in_channels, 1, 1), minval=-bound, maxval=bound,
        dtype=jnp.float32)
    bias = jax.random.uniform(
        kb, (out_channels,), minval=-bound, maxval=bound, dtype=jnp.float32)

    out = jax.block_until_ready(outconv_pallas(x, weight, bias))
    ref = outconv_reference(x, weight, bias)
    assert out.shape == (N, out_channels, H, W), out.shape
    assert jnp.allclose(out, ref, atol=1e-5, rtol=1e-5), "VPU-path mismatch"

    # --- Case 2: larger channels (MXU path) -----------------------------------
    cin2, cout2 = 32, 16
    k2x, k2w, k2b = jax.random.split(key, 3)
    x2 = jax.random.normal(k2x, (N, cin2, H, W), dtype=jnp.float32)
    b2 = 1.0 / (cin2 ** 0.5)
    w2 = jax.random.uniform(k2w, (cout2, cin2, 1, 1), minval=-b2, maxval=b2,
                            dtype=jnp.float32)
    bias2 = jax.random.uniform(k2b, (cout2,), minval=-b2, maxval=b2,
                               dtype=jnp.float32)

    out2 = jax.block_until_ready(outconv_pallas(x2, w2, bias2))
    ref2 = outconv_reference(x2, w2, bias2)
    assert out2.shape == (N, cout2, H, W), out2.shape
    assert jnp.allclose(out2, ref2, atol=1e-4, rtol=1e-4), "MXU-path mismatch"

    print("KERNEL_OK")
</pallas_src>

<mosaic_0001>
module attributes {stable_mosaic.version = 11 : i64} {
  func.func @_outconv_kernel_vpu(%arg0: i32, %arg1: i32, %arg2: memref<3x4xf32, #tpu.memory_space<smem>>, %arg3: memref<3xf32, #tpu.memory_space<smem>>, %arg4: memref<1x4x256xf32, #tpu.memory_space<vmem>>, %arg5: memref<1x3x256xf32, #tpu.memory_space<vmem>>) attributes {dimension_semantics = [#tpu.dimension_semantics<parallel>, #tpu.dimension_semantics<parallel>], iteration_bounds = array<i64: 2, 1>, scalar_prefetch = 0 : i64, scratch_operands = 0 : i64, tpu.core_type = #tpu.core_type<tc>, window_params = [{transform_indices = @transform_0, window_bounds = array<i64: 3, 4>}, {transform_indices = @transform_1, window_bounds = array<i64: 3>}, {transform_indices = @transform_2, window_bounds = array<i64: 1, 4, 256>}, {transform_indices = @transform_3, window_bounds = array<i64: 1, 3, 256>}]} {
    %c0 = arith.constant 0 : index
    %c0_0 = arith.constant 0 : index
    %c0_1 = arith.constant 0 : index
    %0 = vector.load %arg4[%c0, %c0_0, %c0_1] : memref<1x4x256xf32, #tpu.memory_space<vmem>>, vector<1x4x256xf32>
    %1 = vector.shape_cast %0 : vector<1x4x256xf32> to vector<4x256xf32>
    %cst = arith.constant 0.000000e+00 : f32
    %2 = vector.broadcast %cst : f32 to vector<1x256xf32>
    %c0_2 = arith.constant 0 : index
    %c0_3 = arith.constant 0 : index
    %3 = memref.load %arg2[%c0_2, %c0_3] : memref<3x4xf32, #tpu.memory_space<smem>>
    %4 = vector.extract_strided_slice %1 {offsets = [0, 0], sizes = [1, 256], strides = [1, 1]} : vector<4x256xf32> to vector<1x256xf32>
    %5 = vector.broadcast %3 : f32 to vector<1x256xf32>
    %6 = arith.mulf %5, %4 : vector<1x256xf32>
    %7 = arith.addf %2, %6 : vector<1x256xf32>
    %c0_4 = arith.constant 0 : index
    %c1 = arith.constant 1 : index
    %8 = memref.load %arg2[%c0_4, %c1] : memref<3x4xf32, #tpu.memory_space<smem>>
    %9 = vector.extract_strided_slice %1 {offsets = [1, 0], sizes = [1, 256], strides = [1, 1]} : vector<4x256xf32> to vector<1x256xf32>
    %10 = vector.broadcast %8 : f32 to vector<1x256xf32>
    %11 = arith.mulf %10, %9 : vector<1x256xf32>
    %12 = arith.addf %7, %11 : vector<1x256xf32>
    %c0_5 = arith.constant 0 : index
    %c2 = arith.constant 2 : index
    %13 = memref.load %arg2[%c0_5, %c2] : memref<3x4xf32, #tpu.memory_space<smem>>
    %14 = vector.extract_strided_slice %1 {offsets = [2, 0], sizes = [1, 256], strides = [1, 1]} : vector<4x256xf32> to vector<1x256xf32>
    %15 = vector.broadcast %13 : f32 to vector<1x256xf32>
    %16 = arith.mulf %15, %14 : vector<1x256xf32>
    %17 = arith.addf %12, %16 : vector<1x256xf32>
    %c0_6 = arith.constant 0 : index
    %c3 = arith.constant 3 : index
    %18 = memref.load %arg2[%c0_6, %c3] : memref<3x4xf32, #tpu.memory_space<smem>>
    %19 = vector.extract_strided_slice %1 {offsets = [3, 0], sizes = [1, 256], strides = [1, 1]} : vector<4x256xf32> to vector<1x256xf32>
    %20 = vector.broadcast %18 : f32 to vector<1x256xf32>
    %21 = arith.mulf %20, %19 : vector<1x256xf32>
    %22 = arith.addf %17, %21 : vector<1x256xf32>
    %c0_7 = arith.constant 0 : index
    %23 = memref.load %arg3[%c0_7] : memref<3xf32, #tpu.memory_space<smem>>
    %24 = vector.broadcast %23 : f32 to vector<1x256xf32>
    %25 = arith.addf %22, %24 : vector<1x256xf32>
    %c0_8 = arith.constant 0 : index
    %c0_9 = arith.constant 0 : index
    %c0_10 = arith.constant 0 : index
    %26 = vector.load %arg5[%c0_8, %c0_9, %c0_10] : memref<1x3x256xf32, #tpu.memory_space<vmem>>, vector<1x1x256xf32>
    %27 = vector.shape_cast %26 : vector<1x1x256xf32> to vector<1x256xf32>
    %28 = vector.shape_cast %25 : vector<1x256xf32> to vector<1x1x256xf32>
    tpu.vector_store %arg5[%c0_8, %c0_9, %c0_10], %28 {strides = array<i32>} : memref<1x3x256xf32, #tpu.memory_space<vmem>>, vector<1x1x256xf32>,
    %cst_11 = arith.constant 0.000000e+00 : f32
    %29 = vector.broadcast %cst_11 : f32 to vector<1x256xf32>
    %c1_12 = arith.constant 1 : index
    %c0_13 = arith.constant 0 : index
    %30 = memref.load %arg2[%c1_12, %c0_13] : memref<3x4xf32, #tpu.memory_space<smem>>
    %31 = vector.extract_strided_slice %1 {offsets = [0, 0], sizes = [1, 256], strides = [1, 1]} : vector<4x256xf32> to vector<1x256xf32>
    %32 = vector.broadcast %30 : f32 to vector<1x256xf32>
    %33 = arith.mulf %32, %31 : vector<1x256xf32>
    %34 = arith.addf %29, %33 : vector<1x256xf32>
    %c1_14 = arith.constant 1 : index
    %c1_15 = arith.constant 1 : index
    %35 = memref.load %arg2[%c1_14, %c1_15] : memref<3x4xf32, #tpu.memory_space<smem>>
    %36 = vector.extract_strided_slice %1 {offsets = [1, 0], sizes = [1, 256], strides = [1, 1]} : vector<4x256xf32> to vector<1x256xf32>
    %37 = vector.broadcast %35 : f32 to vector<1x256xf32>
    %38 = arith.mulf %37, %36 : vector<1x256xf32>
    %39 = arith.addf %34, %38 : vector<1x256xf32>
    %c1_16 = arith.constant 1 : index
    %c2_17 = arith.constant 2 : index
    %40 = memref.load %arg2[%c1_16, %c2_17] : memref<3x4xf32, #tpu.memory_space<smem>>
    %41 = vector.extract_strided_slice %1 {offsets = [2, 0], sizes = [1, 256], strides = [1, 1]} : vector<4x256xf32> to vector<1x256xf32>
    %42 = vector.broadcast %40 : f32 to vector<1x256xf32>
    %43 = arith.mulf %42, %41 : vector<1x256xf32>
    %44 = arith.addf %39, %43 : vector<1x256xf32>
    %c1_18 = arith.constant 1 : index
    %c3_19 = arith.constant 3 : index
    %45 = memref.load %arg2[%c1_18, %c3_19] : memref<3x4xf32, #tpu.memory_space<smem>>
    %46 = vector.extract_strided_slice %1 {offsets = [3, 0], sizes = [1, 256], strides = [1, 1]} : vector<4x256xf32> to vector<1x256xf32>
    %47 = vector.broadcast %45 : f32 to vector<1x256xf32>
    %48 = arith.mulf %47, %46 : vector<1x256xf32>
    %49 = arith.addf %44, %48 : vector<1x256xf32>
    %c1_20 = arith.constant 1 : index
    %50 = memref.load %arg3[%c1_20] : memref<3xf32, #tpu.memory_space<smem>>
    %51 = vector.broadcast %50 : f32 to vector<1x256xf32>
    %52 = arith.addf %49, %51 : vector<1x256xf32>
    %c0_21 = arith.constant 0 : index
    %c1_22 = arith.constant 1 : index
    %c0_23 = arith.constant 0 : index
    %53 = vector.load %arg5[%c0_21, %c1_22, %c0_23] : memref<1x3x256xf32, #tpu.memory_space<vmem>>, vector<1x1x256xf32>
    %54 = vector.shape_cast %53 : vector<1x1x256xf32> to vector<1x256xf32>
    %55 = vector.shape_cast %52 : vector<1x256xf32> to vector<1x1x256xf32>
    tpu.vector_store %arg5[%c0_21, %c1_22, %c0_23], %55 {strides = array<i32>} : memref<1x3x256xf32, #tpu.memory_space<vmem>>, vector<1x1x256xf32>,
    %cst_24 = arith.constant 0.000000e+00 : f32
    %56 = vector.broadcast %cst_24 : f32 to vector<1x256xf32>
    %c2_25 = arith.constant 2 : index
    %c0_26 = arith.constant 0 : index
    %57 = memref.load %arg2[%c2_25, %c0_26] : memref<3x4xf32, #tpu.memory_space<smem>>
    %58 = vector.extract_strided_slice %1 {offsets = [0, 0], sizes = [1, 256], strides = [1, 1]} : vector<4x256xf32> to vector<1x256xf32>
    %59 = vector.broadcast %57 : f32 to vector<1x256xf32>
    %60 = arith.mulf %59, %58 : vector<1x256xf32>
    %61 = arith.addf %56, %60 : vector<1x256xf32>
    %c2_27 = arith.constant 2 : index
    %c1_28 = arith.constant 1 : index
    %62 = memref.load %arg2[%c2_27, %c1_28] : memref<3x4xf32, #tpu.memory_space<smem>>
    %63 = vector.extract_strided_slice %1 {offsets = [1, 0], sizes = [1, 256], strides = [1, 1]} : vector<4x256xf32> to vector<1x256xf32>
    %64 = vector.broadcast %62 : f32 to vector<1x256xf32>
    %65 = arith.mulf %64, %63 : vector<1x256xf32>
    %66 = arith.addf %61, %65 : vector<1x256xf32>
    %c2_29 = arith.constant 2 : index
    %c2_30 = arith.constant 2 : index
    %67 = memref.load %arg2[%c2_29, %c2_30] : memref<3x4xf32, #tpu.memory_space<smem>>
    %68 = vector.extract_strided_slice %1 {offsets = [2, 0], sizes = [1, 256], strides = [1, 1]} : vector<4x256xf32> to vector<1x256xf32>
    %69 = vector.broadcast %67 : f32 to vector<1x256xf32>
    %70 = arith.mulf %69, %68 : vector<1x256xf32>
    %71 = arith.addf %66, %70 : vector<1x256xf32>
    %c2_31 = arith.constant 2 : index
    %c3_32 = arith.constant 3 : index
    %72 = memref.load %arg2[%c2_31, %c3_32] : memref<3x4xf32, #tpu.memory_space<smem>>
    %73 = vector.extract_strided_slice %1 {offsets = [3, 0], sizes = [1, 256], strides = [1, 1]} : vector<4x256xf32> to vector<1x256xf32>
    %74 = vector.broadcast %72 : f32 to vector<1x256xf32>
    %75 = arith.mulf %74, %73 : vector<1x256xf32>
    %76 = arith.addf %71, %75 : vector<1x256xf32>
    %c2_33 = arith.constant 2 : index
    %77 = memref.load %arg3[%c2_33] : memref<3xf32, #tpu.memory_space<smem>>
    %78 = vector.broadcast %77 : f32 to vector<1x256xf32>
    %79 = arith.addf %76, %78 : vector<1x256xf32>
    %c0_34 = arith.constant 0 : index
    %c2_35 = arith.constant 2 : index
    %c0_36 = arith.constant 0 : index
    %80 = vector.load %arg5[%c0_34, %c2_35, %c0_36] : memref<1x3x256xf32, #tpu.memory_space<vmem>>, vector<1x1x256xf32>
    %81 = vector.shape_cast %80 : vector<1x1x256xf32> to vector<1x256xf32>
    %82 = vector.shape_cast %79 : vector<1x256xf32> to vector<1x1x256xf32>
    tpu.vector_store %arg5[%c0_34, %c2_35, %c0_36], %82 {strides = array<i32>} : memref<1x3x256xf32, #tpu.memory_space<vmem>>, vector<1x1x256xf32>,
    return
  }
  func.func @transform_0(%arg0: i32, %arg1: i32) -> (i32, i32) {
    %c0_i32 = arith.constant 0 : i32
    %c0_i32_0 = arith.constant 0 : i32
    %c0_i32_1 = arith.constant 0 : i32
    return %c0_i32, %c0_i32_0 : i32, i32
  }
  func.func @transform_1(%arg0: i32, %arg1: i32) -> i32 {
    %c0_i32 = arith.constant 0 : i32
    %c0_i32_0 = arith.constant 0 : i32
    return %c0_i32 : i32
  }
  func.func @transform_2(%arg0: i32, %arg1: i32) -> (i32, i32, i32) {
    %c0_i32 = arith.constant 0 : i32
    %c0_i32_0 = arith.constant 0 : i32
    return %arg0, %c0_i32, %arg1 : i32, i32, i32
  }
  func.func @transform_3(%arg0: i32, %arg1: i32) -> (i32, i32, i32) {
    %c0_i32 = arith.constant 0 : i32
    %c0_i32_0 = arith.constant 0 : i32
    return %arg0, %c0_i32, %arg1 : i32, i32, i32
  }
}

</mosaic_0001>

<bundles_post_ra>
// kernel: tpu_custom_call.1
= control target key start
LH: loop header
LB: loop body
LE: loop exit
PB: predicated region body
PF: predicated region fallthrough
CT: control target
= control target key end

     0   :  { %8 = vsyncpa [#allocation4], 0  ;;  %s966_s0 = inlined_call_operand.hbm [shape: f32[3,4], index: 0, kind: input, shape index: {}]   ;;  %s967_s1 = inlined_call_operand.vmem [shape: f32[3], index: 1, kind: input, shape index: {}]   ;;  %s968_s2 = inlined_call_operand.hbm [shape: f32[2,4,256], index: 2, kind: input, shape index: {}]   ;;  %s969_s3 = inlined_call_operand.vmem [shape: f32[2,3,256], index: 3, kind: output, shape index: {}]  }
   0x1   :  { %9 = vsyncpa [#allocation5], 0 }
   0x2   :  { %10 = vsyncpa [#allocation3], 0 }
   0x3   :  { %12 = vsyncpa [#allocation3 + $0x1], 0  ;;  %s774_s12 = smov 0   ;;  %s776_s13 = smov 0  }
   0x4   :  { %s778_s14 = smov 0   ;;  %s780_s15 = smov 0  }
   0x5   :  { %s782_s16 = smov 0   ;;  %s784_s17 = smov 0  }
   0x6 LB: > { %s512_s18 = sadd.s32 4294967295, %s748_s17   ;;  %p94_p0 = scmp.ne.s32.totalorder %s732_s13, %s728_s12  ;;  %s748_s17 = sphi %s784_s17, %s18_s17   ;;  %s744_s16 = sphi %s782_s16, %s985_s16   ;;  %s740_s15 = sphi %s780_s15, %s984_s15   ;;  %s736_s14 = sphi %s778_s14, %s983_s14   ;;  %s732_s13 = sphi %s776_s13, %s982_s13   ;;  %s728_s12 = sphi %s774_s12, %s981_s12  }
   0x7   : > { %p804_p1 = scmp.eq.s32.totalorder %s512_s18, 0  ;;  %p514_p2 = scmp.ge.s32.totalorder %s748_s17, 1 }
   0x8   : > { %p133_p3 = scmp.lt.s32.totalorder %s748_s17, 3  ;;  %s155_s24 = sshll.u32 %s967_s1, 4  ;;  %s156_s24 = int_to_ptr.vmem [resolvable:$true] %s155_s24 }
   0x9   : > { %s973_s19 = scalar_select %p804_p1, 1, 0 }
   0xa   : > { %p812_p4 = por %p804_p1, %p94_p0  ;;  %p816_p5 = pnand %p514_p2, %p133_p3 }
   0xb   : > { %s30_s26 = sadd.s32 1, %s744_s16  ;;  %s632_s30 = scalar_lea.hbm %s966_s0, 64 }
   0xc   : > { %s974_s20 = scalar_select %p812_p4, 1, 0 }
   0xd   : > { %p565_p6 = pneg %p816_p5  ;;  %p832_p8 = scmp.ge.s32.totalorder %s30_s26, 2 }
   0xe   : > { %p633_p9 = scmp.ne.s32.totalorder %s966_s0, %s632_s30  ;;  %p639_p13 = scmp.lt.u32.totalorder %s632_s30, %s966_s0 }
   0xf   : > { %p827_p7 = pnand %p565_p6, %p804_p1 }
  0x11   : > { %p634_p10 = pneg %p827_p7 }
  0x13   : > { %p635_p11 = pnand %p634_p10, %p633_p9 }
  0x15   : > { %p636_p12 = pneg %p635_p11 }
  0x17   : > { %p641_p0 = pnand %p639_p13, %p636_p12 }
  0x19   : > { %644 = shalt.err (!%p641_p0)
}
  0x1a   : > { %s750_s8 = smov [#allocation2]   ;;  %s645_s11 = scalar_lea.vmem %s156_s24, 16 }
  0x1b   : > { %568 = dma.hbm_to_smem (!%p827_p7), %s966_s0, 64, %s750_s8, [#allocation4]  }
  0x1c   : > { %p646_p2 = scmp.ne.s32.totalorder %s156_s24, %s645_s11  ;;  %p653_p4 = scmp.lt.s32.totalorder %s156_s24, %s156_s24 }
  0x1d   : > { %p654_p9 = scmp.lt.s32.totalorder %s645_s11, %s645_s11 }
  0x1e   : > { %p648_p3 = pnand %p646_p2, %p634_p10 }
  0x1f   : > { %p655_p11 = por %p654_p9, %p653_p4 }
  0x20   : > { %p649_p6 = pneg %p648_p3 }
  0x22   : > { %p656_p1 = pnand %p655_p11, %p649_p6 }
  0x24   : > { %659 = shalt.err (!%p656_p1)
}
  0x25   : > { %s751_s12 = smov [#allocation6]   ;;  %s987_s26 = smov (%p832_p8, %s30_s26), 0 }
  0x26   : > { %571 = dma.vmem_to_smem (!%p827_p7), %s156_s24, 16, %s751_s12, [#allocation5]  }
  0x27   : > { %s81_s18 = sadd.s32 1, %s736_s14  ;;  %p88_p1 = scmp.ne.s32.totalorder %s736_s14, %s732_s13 }
  0x28   : > { %s76_s22 = ssub.s32 %s744_s16, %s987_s26  ;;  %p89_p4 = scmp.eq.s32.totalorder %s748_s17, 0 }
  0x29   : > { %p79_p10 = scmp.eq.s32.totalorder %s76_s22, 0  ;;  %p578_p12 = scmp.lt.s32.totalorder %s748_s17, 2 }
  0x2a   : > { %p90_p13 = por %p89_p4, %p88_p1  ;;  %s166_s23 = sand.u32 1, %s736_s14  }
  0x2b   : > { %s867_s25 = scalar_select %p79_p10, %s736_s14, %s81_s18  }
  0x2c   : > { %s518_s28 = sshll.u32 %s166_s23, 3  ;;  %s553_s29 = sshll.u32 %s744_s16, 7 }
  0x2d   : > { %s873_s24 = scalar_lea.hbm %s968_s2, %s553_s29  ;;  %s170_s27 = scalar_lea.vmem [#allocation7], %s518_s28 }
  0x2e   : > { %s180_s5 = sshll.u32 %s170_s27, 4  ;;  %p877_p7 = pnand %p578_p12, %p90_p13  ;;  %s875_s5 = int_to_ptr.vmem [resolvable:$true] %s180_s5 }
  0x2f   : > { %s167_s7 = scalar_lea.sflag [#allocation3], %s166_s23  ;;  %s660_s8 = scalar_lea.hbm %s873_s24, 128 }
  0x30   : > { %p661_p8 = scmp.ne.s32.totalorder %s873_s24, %s660_s8  ;;  %p662_p0 = pneg %p877_p7 }
  0x31   : > { %s665_s11 = scalar_lea.hbm %s968_s2, 256  ;;  %p666_p6 = scmp.lt.u32.totalorder %s873_s24, %s968_s2 }
  0x32   : > { %p663_p2 = pnand %p662_p0, %p661_p8  ;;  %p667_p9 = scmp.lt.u32.totalorder %s665_s11, %s660_s8 }
  0x33   : > { %p669_p1 = scmp.lt.u32.totalorder %s660_s8, %s873_s24 }
  0x34   : > { %p664_p3 = pneg %p663_p2  ;;  %p668_p11 = por %p667_p9, %p666_p6 }
  0x36   : > { %p670_p4 = por %p669_p1, %p668_p11 }
  0x38   : > { %p671_p10 = pnand %p670_p4, %p664_p3 }
  0x3a   : > { %674 = shalt.err (!%p671_p10)
}
  0x3b   : > { %s675_s22 = scalar_lea.vmem %s875_s5, 128  ;;  %s752_s23 = smov [#allocation7]  }
  0x3c   : > { %p676_p12 = scmp.ne.s32.totalorder %s875_s5, %s675_s22  ;;  %s680_s28 = sshll.u32 %s752_s23, 4  ;;  %s681_s28 = int_to_ptr.vmem [resolvable:$false] %s680_s28 }
  0x3d   : > { %s682_s29 = scalar_lea.vmem %s681_s28, 256  ;;  %p683_p2 = scmp.lt.s32.totalorder %s875_s5, %s681_s28 }
  0x3e   : > { %p678_p13 = pnand %p676_p12, %p662_p0  ;;  %p684_p6 = scmp.lt.s32.totalorder %s682_s29, %s675_s22 }
  0x40   : > { %p679_p8 = pneg %p678_p13  ;;  %p685_p9 = por %p684_p6, %p683_p2 }
  0x42   : > { %p686_p11 = pnand %p685_p9, %p679_p8 }
  0x44   : > { %689 = shalt.err (!%p686_p11)
}
  0x45   : > { %575 = dma.hbm_to_vmem [thread:$0]  (!%p877_p7), %s873_s24, 128, %s875_s5, %s167_s7  }
  0x46   : > { %189 = sbr.rel (%p816_p5) target bundleno = 117 (0x75), region = 32  ;;  %p979_p0 = scmp.ne.s32.totalorder (!%p816_p5), %s973_s19, 0 }
  0x4d   : > { %715 = dma.done.wait (%p979_p0), [#allocation4], 64  }
  0x4e   : > { %717 = vsyncadd (%p979_p0), [#allocation4], 4294967232 }
  0x4f   : > { %719 = dma.done.wait (%p979_p0), [#allocation5], 16  }
  0x50   : > { %721 = vsyncadd (%p979_p0), [#allocation5], 4294967280  ;;  %s199_s30 = sand.u32 1, %s732_s13   ;;  %p980_p7 = scmp.ne.s32.totalorder %s974_s20, 0 }
  0x51   : > { %s524_s4 = sshll.u32 %s199_s30, 3  ;;  %s200_s24 = scalar_lea.sflag [#allocation3], %s199_s30 }
  0x52   : > { %s203_s27 = scalar_lea.vmem [#allocation7], %s524_s4 }
  0x53   : > { %723 = dma.done.wait (%p980_p7), %s200_s24, 128  }
  0x54   : > { %725 = vsyncadd (%p980_p7), %s200_s24, 4294967168 }
  0x55   : > { %208 = sfence }
  0x56   : > { %s243_s21 = sld [smem:[#allocation2]]  ;;  %s527_s5 = sld [smem:[#allocation2 + $0x1]]  ;;  %v753_v0 = vmov 1966171168   ;;  %v278_v2 = vlaneseq  ;;  %v242_v3 = vld [vmem:[%s203_s27] sm:$0xff] }
  0x57   : > { %s529_s6 = sld [smem:[#allocation2 + $0x2]]  ;;  %s531_s7 = sld [smem:[#allocation2 + $0x3]]  ;;  %v276_v1 = vunpack.c.l.s4 %v753_v0 }
  0x58   : > { %s533_s19 = sld [smem:[#allocation2 + $0x80]]  ;;  %s534_s9 = sld [smem:[#allocation2 + $0x81]]  ;;  %v279_v8 = vshrl.u32 %v278_v2, 7  ;;  %vm292_vm0 = vcmp.lt.s32.totalorder %v278_v2, 256 }
  0x59   : > { %s921_s8 = sld [smem:[#allocation6]]  ;;  %s536_s10 = sld [smem:[#allocation2 + $0x82]]  ;;  %v277_v7 = vunpack.c.0.s8 %v276_v1 }
  0x5a   : > { %s923_s11 = sld [smem:[#allocation2 + $0x83]]  ;;  %s542_s20 = sld [smem:[#allocation2 + $0x100]] }
  0x5b   : > { %s926_s12 = sld [smem:[#allocation2 + $0x101]]  ;;  %s928_s18 = sld [smem:[#allocation2 + $0x102]]  ;;  %v280_v17 = vsub.s32 %v277_v7, %v279_v8 }
  0x5c   : > { %v244_v4 = vstv %s243_s21  ;;  %v248_v5 = vstv %s527_s5  ;;  %s930_s22 = sld [smem:[#allocation2 + $0x103]]  ;;  %p233_p5 = scmp.lt.s32.totalorder %s740_s15, 1 }
  0x5d   : > { %v256_v6 = vstv %s529_s6  ;;  %v245_v9 = vmul.f32 %v244_v4, %v242_v3  ;;  %v249_v10 = vmul.f32 %v248_v5, %v242_v3  ;;  %v264_v12 = vstv %s531_s7  ;;  %s933_s23 = sld [smem:[#allocation6 + $0x1]]  ;;  %s549_s28 = sld [smem:[#allocation6 + $0x2]] }
  0x5e   : > { %v257_v11 = vmul.f32 %v256_v6, %v242_v3  ;;  %v265_v15 = vmul.f32 %v264_v12, %v242_v3  ;;  %v296_v16 = vstv %s533_s19  ;;  %v300_v19 = vstv %s534_s9  ;;  %s989_s15 = smov (!%p233_p5, %s740_s15), 1 }
  0x5f   : > { %v528_v13 = vrot.slane %v249_v10, 9  ;;  %v297_v18 = vmul.f32 %v296_v16, %v242_v3  ;;  %v301_v22 = vmul.f32 %v300_v19, %v242_v3  ;;  %v308_v23 = vstv %s536_s10  ;;  %s554_s29 = sshll.u32 %s989_s15, 3 }
  0x60   : > { %v530_v14 = vrot.slane %v257_v11, 10  ;;  %v532_v21 = vrot.slane %v265_v15, 11  ;;  %v272_v24 = vstv %s921_s8  ;;  %v309_v25 = vmul.f32 %v308_v23, %v242_v3  ;;  %s240_s24 = scalar_lea.vmem %s969_s3, %s554_s29 }
  0x61   : > { %v254_v20 = vadd.f32 %v528_v13, %v245_v9  ;;  %v316_v26 = vstv %s923_s11  ;;  %v345_v27 = vstv %s542_s20  ;;  %v535_v29 = vrot.slane %v301_v22, 9 }
  0x62   : > { %v317_v30 = vmul.f32 %v316_v26, %v242_v3  ;;  %v346_v31 = vmul.f32 %v345_v27, %v242_v3  ;;  %v537_v32 = vrot.slane %v309_v25, 10  ;;  %v349_v33 = vstv %s926_s12 }
  0x63   : > { %v262_v28 = vadd.f32 %v530_v14, %v254_v20  ;;  %v357_v34 = vstv %s928_s18  ;;  %v365_v35 = vstv %s930_s22  ;;  %v306_v37 = vadd.f32 %v535_v29, %v297_v18 }
  0x64   : > { %v539_v38 = vrot.slane %v317_v30, 11  ;;  %v350_v39 = vmul.f32 %v349_v33, %v242_v3  ;;  %v358_v40 = vmul.f32 %v357_v34, %v242_v3  ;;  %v366_v41 = vmul.f32 %v365_v35, %v242_v3 }
  0x65   : > { %v270_v36 = vadd.f32 %v532_v21, %v262_v28  ;;  %v314_v43 = vadd.f32 %v537_v32, %v306_v37  ;;  %v324_v45 = vstv %s933_s23  ;;  %v373_v54 = vstv %s549_s28 }
  0x66   : > { %v544_v44 = vrot.slane %v350_v39, 9  ;;  %v546_v46 = vrot.slane %v358_v40, 10  ;;  %v548_v50 = vrot.slane %v366_v41, 11 }
  0x67   : > { %v273_v42 = vadd.f32 %v272_v24, %v270_v36  ;;  %v322_v48 = vadd.f32 %v539_v38, %v314_v43 }
  0x68   : > { %v355_v49 = vadd.f32 %v544_v44, %v346_v31 }
  0x69   : > { %v281_v47 = vrot.slane %v273_v42, %v280_v17  ;;  %v325_v52 = vadd.f32 %v324_v45, %v322_v48 }
  0x6a   : > { %v363_v53 = vadd.f32 %v546_v46, %v355_v49 }
  0x6b   : > { %v288_v51 = vrot.slane %v281_v47, %v280_v17  ;;  %v333_v55 = vrot.slane %v325_v52, %v280_v17 }
  0x6c   : > { %v371_v56 = vadd.f32 %v548_v50, %v363_v53 }
  0x6d   : > { %294 = vst.msk [vmem:[%s240_s24] ss:$4 sm:$0x3] %vm292_vm0, %v288_v51  ;;  %v340_v57 = vrot.slane %v333_v55, %v280_v17 }
  0x6e   : > { %v374_v58 = vadd.f32 %v373_v54, %v371_v56 }
  0x6f   : > { %541 = vst.msk [vmem:[%s240_s24 + $0x1] ss:$4 sm:$0x3] %vm292_vm0, %v340_v57 }
  0x70   : > { %v382_v59 = vrot.slane %v374_v58, %v280_v17 }
  0x72   : > { %v389_v60 = vrot.slane %v382_v59, %v280_v17 }
  0x74   : > { %550 = vst.msk [vmem:[%s240_s24 + $0x2] ss:$4 sm:$0x3] %vm292_vm0, %v389_v60 }
  0x75 PF: > { %s18_s17 = sadd.s32 1, %s748_s17   ;;  %s981_s12 = smov %s732_s13 }
  0x76   : > { %p15_p3 = scmp.ge.s32.totalorder %s18_s17, 4   ;;  %s982_s13 = smov %s736_s14 }
  0x77   : > { %s983_s14 = smov %s867_s25  ;;  %s984_s15 = smov %s744_s16 }
  0x78   : > { %s985_s16 = smov %s987_s26  ;;  %17 = sbr.rel (!%p15_p3) target bundleno = 6 (0x6), region = 84 }
  0x7f   :  { %423 = vsyncpa [#allocation3], 1 }
  0x80   :  { %425 = vsyncpa [#allocation3 + $0x1], 1 }
  0x81   :  { %426 = vsyncpa [#allocation4], 1 }
  0x82   :  { %428 = vsyncpa [#allocation4 + $0x1], 1 }
  0x83   :  { %429 = vsyncpa [#allocation5], 1 }
  0x84   :  { %431 = vsyncpa [#allocation5 + $0x1], 1 }

</bundles_post_ra>
